<compile_context>
chip_gen: v6e
topology: v6e:2x2x1
jax: 0.10.0
libtpu: 0.0.40
codegen_flags: <defaults>
</compile_context>

<pallas_src>
import functools
import math

import jax
import jax.numpy as jnp
from jax.experimental import pallas as pl
from jax.experimental.pallas import tpu as pltpu


# ---------------------------------------------------------------------------
# Parameter (buffer) construction — deterministic, mirrors the PyTorch __init__
# ---------------------------------------------------------------------------
def make_pos_embedding(emb_size: int, maxlen: int = 500) -> jnp.ndarray:
    """Returns the (maxlen, emb_size) sinusoidal positional-encoding table."""
    assert emb_size % 2 == 0, "emb_size must be even (matches PyTorch module)"
    den = jnp.exp(-jnp.arange(0, emb_size, 2, dtype=jnp.float32)
                  * (math.log(10000.0) / emb_size))            # (E/2,)
    pos = jnp.arange(0, maxlen, dtype=jnp.float32)[:, None]    # (maxlen, 1)
    angles = pos * den[None, :]                                 # (maxlen, E/2)
    pe = jnp.zeros((maxlen, emb_size), dtype=jnp.float32)
    pe = pe.at[:, 0::2].set(jnp.sin(angles))
    pe = pe.at[:, 1::2].set(jnp.cos(angles))
    return pe


def flatten_pos_embedding(pos_embedding: jnp.ndarray, seq_len: int,
                          dtype) -> jnp.ndarray:
    """Slice/cast/flatten the table ONCE at init (hoisted out of the forward)."""
    E = pos_embedding.shape[-1]
    return pos_embedding[:seq_len, :].astype(dtype).reshape(1, seq_len * E)


# ---------------------------------------------------------------------------
# Counter-based hash for dropout (pure int32 ops: lowers on TPU and interpret)
# ---------------------------------------------------------------------------
def _as_i32(x: int) -> int:
    x &= 0xFFFFFFFF
    return x - (1 << 32) if x >= (1 << 31) else x


_HASH_M1 = _as_i32(0x7FEB352D)   # lowbias32 multipliers
_HASH_M2 = _as_i32(0x846CA68B)
_SEED_MIX = _as_i32(0x9E3779B9)  # golden-ratio seed mixer


def _srl(x, k: int):
    """Logical right shift for int32 (arithmetic shift + mask of sign bits)."""
    return (x >> k) & ((1 << (32 - k)) - 1)


def _hash_i32(x):
    """lowbias32-style avalanche hash on int32 (wrapping arithmetic)."""
    x = x ^ _srl(x, 16)
    x = x * _HASH_M1
    x = x ^ _srl(x, 15)
    x = x * _HASH_M2
    x = x ^ _srl(x, 16)
    return x


# ---------------------------------------------------------------------------
# Kernels (operate on flattened (B, S*E) layout)
# ---------------------------------------------------------------------------
def _pe_eval_kernel(x_ref, pe_ref, o_ref):
    # x_ref: (Bt, T); pe_ref: (1, T) broadcasts over the row (batch) dim.
    o_ref[...] = (x_ref[...] + pe_ref[...]).astype(o_ref.dtype)


def _pe_train_kernel(seed_ref, x_ref, pe_ref, o_ref, *,
                     p: float, row_tile: int, col_tile: int, n_cols: int):
    # Dropout mask is a pure function of (seed, global element index), so it is
    # independent of tiling, grid shape and TPU generation.
    c = pl.program_id(0)
    b = pl.program_id(1)
    shape = x_ref.shape
    rows = jax.lax.broadcasted_iota(jnp.int32, shape, 0) + b * row_tile
    cols = jax.lax.broadcasted_iota(jnp.int32, shape, 1) + c * col_tile
    idx = rows * n_cols + cols                       # global flat index (wraps)
    h = _hash_i32(idx ^ (seed_ref[0] * _SEED_MIX))
    r = h & 0x7FFFFF                                 # uniform in [0, 2^23)
    threshold = int(round(p * float(1 << 23)))       # drop iff r < threshold
    keep = r >= threshold

    y = x_ref[...] + pe_ref[...]
    scale = jnp.asarray(1.0 / (1.0 - p), dtype=y.dtype)
    o_ref[...] = jnp.where(keep, y * scale, jnp.zeros_like(y)).astype(o_ref.dtype)


# ---------------------------------------------------------------------------
# Tiling heuristic
# ---------------------------------------------------------------------------
def _round_up(x: int, m: int) -> int:
    return ((x + m - 1) // m) * m


def _target_block_bytes() -> int:
    """Per-block byte target, generation-aware when the TPU is detectable."""
    try:
        info = pltpu.get_tpu_info()
        vmem = int(getattr(info, "vmem_capacity_bytes", 0))
    except Exception:  # interpret mode / CPU / API drift
        vmem = 0
    if 0 < vmem <= 64 * 1024 * 1024:
        # v7x-class: ~3.2 TB/s per-TC HBM BW makes the ~0.35 us/step cost
        # expensive; 6 MiB x ~4 live buffers ~= 24 MiB, safe in 64 MiB VMEM.
        return 6 * 1024 * 1024
    # v5e / v6e (128 MiB VMEM) or unknown backend.
    return 4 * 1024 * 1024


def _choose_tiles(B: int, N: int, itemsize: int, target_bytes: int):
    """Pick (Bt, T) for the (B, N) flattened view.

    T: lane-dim tile, a multiple of 128 (or == N when N <= 128).
    Bt: row tile, a multiple of the dtype's sublane packing (or == B).
    The grid uses pl.cdiv, so neither needs to divide the array (the ragged
    last block is safe for this elementwise op).
    """
    # Dtype-aware sublane packing: f32 -> 8 rows, bf16 -> 16, int8/fp8 -> 32.
    min_rows = max(8, 8 * (4 // max(1, itemsize)))

    if N <= 128:
        T = N                                       # full (and only) lane block
    else:
        base_rows = B if B < min_rows else min_rows
        cols = target_bytes // max(1, base_rows * itemsize)
        T = max(128, (cols // 128) * 128)
        T = min(T, _round_up(N, 128))

    if B <= min_rows:
        Bt = B
    else:
        rows = target_bytes // max(1, T * itemsize)
        rows = max(min_rows, (rows // min_rows) * min_rows)
        Bt = B if rows >= B else rows

    # v7x has two TensorCores sharing "parallel" grid axes: make sure any
    # non-tiny problem yields at least 2 blocks so both cores get work.
    total = B * N * itemsize
    if total > 2 * 1024 * 1024 and pl.cdiv(N, T) * pl.cdiv(B, Bt) < 2:
        if N > 256:
            T = max(128, _round_up(_round_up(N, 128) // 2, 128))
        elif B > min_rows:
            Bt = max(min_rows, _round_up(pl.cdiv(B, 2), min_rows))
    return Bt, T


# ---------------------------------------------------------------------------
# Wrapper
# ---------------------------------------------------------------------------
def positional_encoding_forward(token_embedding: jnp.ndarray,
                                pos_embedding: jnp.ndarray,
                                *,
                                dropout: float = 0.1,
                                training: bool = False,
                                seed: int = 0,
                                donate_x: bool = False) -> jnp.ndarray:
    """token_embedding: (B, S, E).

    pos_embedding: either the full (maxlen, E) buffer or a pre-flattened
    (1, S*E) slab from flatten_pos_embedding (preferred: hoists the per-call
    slice/cast/reshape out of the forward).
    """
    B, S, E = token_embedding.shape
    N = S * E
    dtype = token_embedding.dtype

    # Flatten so the kernel sees a wide, lane-dense last dim even when E < 128.
    x2 = token_embedding.reshape(B, N)
    if pos_embedding.ndim == 2 and pos_embedding.shape == (1, N) \
            and pos_embedding.dtype == dtype:
        pe2 = pos_embedding                          # already hoisted at init
    else:
        pe2 = pos_embedding[:S, :].astype(dtype).reshape(1, N)

    Bt, T = _choose_tiles(B, N, jnp.dtype(dtype).itemsize, _target_block_bytes())
    nc, nb = pl.cdiv(N, T), pl.cdiv(B, Bt)

    out_shape = jax.ShapeDtypeStruct((B, N), dtype)
    # Fits v5e's 16 MiB scoped default is exceeded by 4 MiB tiles -> raise the
    # limit explicitly; 40 MiB is still well under v7x's 64 MiB physical VMEM.
    params = pltpu.CompilerParams(
        dimension_semantics=("parallel", "parallel"),
        vmem_limit_bytes=40 * 1024 * 1024)

    # Grid order: column tiles outer, batch tiles inner -> pe's block index is
    # constant across the inner loop, so pe is DMA'd into VMEM exactly once.
    if training and dropout > 0.0:
        assert dropout < 1.0, "dropout rate must be < 1 for the training path"
        kernel = functools.partial(_pe_train_kernel, p=float(dropout),
                                   row_tile=Bt, col_tile=T, n_cols=N)
        out = pl.pallas_call(
            kernel,
            out_shape=out_shape,
            grid_spec=pltpu.PrefetchScalarGridSpec(
                num_scalar_prefetch=1,
                grid=(nc, nb),
                in_specs=[
                    pl.BlockSpec((Bt, T), lambda c, b, seed_ref: (b, c)),
                    pl.BlockSpec((1, T), lambda c, b, seed_ref: (0, c)),
                ],
                out_specs=pl.BlockSpec((Bt, T), lambda c, b, seed_ref: (b, c)),
            ),
            compiler_params=params,
            input_output_aliases=({1: 0} if donate_x else {}),
        )(jnp.asarray([seed], dtype=jnp.int32), x2, pe2)
    else:
        # eval mode (dropout is identity)
        out = pl.pallas_call(
            _pe_eval_kernel,
            out_shape=out_shape,
            grid=(nc, nb),
            in_specs=[
                pl.BlockSpec((Bt, T), lambda c, b: (b, c)),
                pl.BlockSpec((1, T), lambda c, b: (0, c)),
            ],
            out_specs=pl.BlockSpec((Bt, T), lambda c, b: (b, c)),
            compiler_params=params,
            input_output_aliases=({0: 0} if donate_x else {}),
        )(x2, pe2)

    return out.reshape(B, S, E)


# ---------------------------------------------------------------------------
# Demo / correctness check
# ---------------------------------------------------------------------------
if __name__ == "__main__":
    B, S, E = 2, 8, 32          # batch, seq, emb_size
    MAXLEN = 500
    DROPOUT = 0.1               # constructor arg; eval mode => identity

    key = jax.random.PRNGKey(0)
    x = jax.random.normal(key, (B, S, E), dtype=jnp.float32)

    pos_embedding = make_pos_embedding(E, MAXLEN)
    pe_flat = flatten_pos_embedding(pos_embedding, S, x.dtype)  # hoisted once

    # ---- eval path (default) ------------------------------------------------
    out = positional_encoding_forward(x, pe_flat,
                                      dropout=DROPOUT, training=False)
    out = jax.block_until_ready(out)

    # pure-JAX reference of the PyTorch forward (eval mode): permutes cancel
    ref = jnp.transpose(
        jnp.transpose(x, (1, 0, 2)) + pos_embedding[:S][:, None, :],
        (1, 0, 2))

    assert out.shape == x.shape and out.dtype == x.dtype
    assert jnp.allclose(out, ref, atol=1e-6, rtol=1e-6)

    # ---- training path (dropout active) -------------------------------------
    out_tr = positional_encoding_forward(x, pe_flat,
                                         dropout=DROPOUT, training=True,
                                         seed=123)
    out_tr = jax.block_until_ready(out_tr)
    assert out_tr.shape == x.shape and out_tr.dtype == x.dtype
    kept = out_tr != 0
    frac_dropped = 1.0 - float(jnp.mean(kept.astype(jnp.float32)))
    assert 0.0 < frac_dropped < 0.5, f"unexpected drop fraction {frac_dropped}"
    scale = 1.0 / (1.0 - DROPOUT)
    err = jnp.where(kept, out_tr - ref * scale, 0.0)
    assert float(jnp.max(jnp.abs(err))) < 1e-4

    print("KERNEL_OK")
</pallas_src>

<mosaic_0001>
module attributes {stable_mosaic.version = 11 : i64} {
  func.func @_pe_eval_kernel(%arg0: i32, %arg1: i32, %arg2: memref<2x256xf32, #tpu.memory_space<vmem>>, %arg3: memref<1x256xf32, #tpu.memory_space<vmem>>, %arg4: memref<2x256xf32, #tpu.memory_space<vmem>>) attributes {dimension_semantics = [#tpu.dimension_semantics<parallel>, #tpu.dimension_semantics<parallel>], iteration_bounds = array<i64: 1, 1>, scalar_prefetch = 0 : i64, scratch_operands = 0 : i64, tpu.core_type = #tpu.core_type<tc>, window_params = [{transform_indices = @transform_0, window_bounds = array<i64: 2, 256>}, {transform_indices = @transform_1, window_bounds = array<i64: 1, 256>}, {transform_indices = @transform_2, window_bounds = array<i64: 2, 256>}]} {
    %c0 = arith.constant 0 : index
    %c0_0 = arith.constant 0 : index
    %0 = vector.load %arg2[%c0, %c0_0] : memref<2x256xf32, #tpu.memory_space<vmem>>, vector<2x256xf32>
    %c0_1 = arith.constant 0 : index
    %c0_2 = arith.constant 0 : index
    %1 = vector.load %arg3[%c0_1, %c0_2] : memref<1x256xf32, #tpu.memory_space<vmem>>, vector<1x256xf32>
    %2 = vector.broadcast %1 : vector<1x256xf32> to vector<2x256xf32>
    %3 = arith.addf %0, %2 : vector<2x256xf32>
    %c0_3 = arith.constant 0 : index
    %c0_4 = arith.constant 0 : index
    %4 = vector.load %arg4[%c0_3, %c0_4] : memref<2x256xf32, #tpu.memory_space<vmem>>, vector<2x256xf32>
    tpu.vector_store %arg4[%c0_3, %c0_4], %3 {strides = array<i32>} : memref<2x256xf32, #tpu.memory_space<vmem>>, vector<2x256xf32>,
    return
  }
  func.func @transform_0(%arg0: i32, %arg1: i32) -> (i32, i32) {
    %c0_i32 = arith.constant 0 : i32
    return %arg1, %arg0 : i32, i32
  }
  func.func @transform_1(%arg0: i32, %arg1: i32) -> (i32, i32) {
    %c0_i32 = arith.constant 0 : i32
    %c0_i32_0 = arith.constant 0 : i32
    return %c0_i32, %arg0 : i32, i32
  }
  func.func @transform_2(%arg0: i32, %arg1: i32) -> (i32, i32) {
    %c0_i32 = arith.constant 0 : i32
    return %arg1, %arg0 : i32, i32
  }
}

</mosaic_0001>

<bundles_post_ra>
// kernel: tpu_custom_call.1
= control target key start
LH: loop header
LB: loop body
LE: loop exit
PB: predicated region body
PF: predicated region fallthrough
CT: control target
= control target key end

     0   :  { %7 = vsyncpa [#allocation3], 0  ;;  %s172_s0 = inlined_call_operand.hbm [shape: f32[2,256], index: 0, kind: input, shape index: {}]   ;;  %s173_s1 = inlined_call_operand.hbm [shape: f32[1,256], index: 1, kind: input, shape index: {}]   ;;  %s174_s2 = inlined_call_operand.hbm [shape: f32[2,256], index: 2, kind: output, shape index: {}]  }
   0x1   :  { %8 = vsyncpa [#allocation6], 0 }
   0x2   :  { %9 = vsyncpa [#allocation4], 0  ;;  %s144_s9 = smov [#allocation2]   ;;  %s145_s11 = smov [#allocation5]  }
   0x3   :  { %s16_s10 = sshll.u32 %s144_s9, 4  ;;  %s26_s12 = sshll.u32 %s145_s11, 4  ;;  %s17_s10 = int_to_ptr.vmem [resolvable:$true] %s16_s10  ;;  %s27_s12 = int_to_ptr.vmem [resolvable:$true] %s26_s12 }
   0x4   :  { %s86_s13 = scalar_lea.vmem %s17_s10, 64  ;;  %p91_p1 = scmp.lt.s32.totalorder %s17_s10, %s17_s10 }
   0x5   :  { %p87_p0 = scmp.ne.s32.totalorder %s17_s10, %s86_s13  ;;  %p92_p2 = scmp.lt.s32.totalorder %s86_s13, %s86_s13 }
   0x7   :  { %p93_p3 = por %p92_p2, %p91_p1 }
   0x9   :  { %p94_p4 = pnand %p93_p3, %p87_p0 }
   0xb   :  { %97 = shalt.err (!%p94_p4)
}
   0xc   :  { %19 = dma.hbm_to_vmem [thread:$0]  %s172_s0, 64, %s17_s10, [#allocation3]  }
   0xd   :  { %s106_s16 = scalar_lea.vmem %s27_s12, 32  ;;  %p111_p6 = scmp.lt.s32.totalorder %s27_s12, %s27_s12 }
   0xe   :  { %p107_p5 = scmp.ne.s32.totalorder %s27_s12, %s106_s16  ;;  %p112_p7 = scmp.lt.s32.totalorder %s106_s16, %s106_s16 }
  0x10   :  { %p113_p8 = por %p112_p7, %p111_p6 }
  0x12   :  { %p114_p9 = pnand %p113_p8, %p107_p5 }
  0x14   :  { %117 = shalt.err (!%p114_p9)
}
  0x15   :  { %29 = dma.hbm_to_vmem [thread:$0]  %s173_s1, 32, %s27_s12, [#allocation6]  }
  0x16   :  { %138 = dma.done.wait [#allocation3], 64  }
  0x17   :  { %139 = vsyncadd [#allocation3], 4294967232 }
  0x18   :  { %140 = dma.done.wait [#allocation6], 32  }
  0x19   :  { %141 = vsyncadd [#allocation6], 4294967264  ;;  %v39_v0 = vlaneseq  ;;  %v146_v1 = vmov 1983009808   ;;  %v37_v7 = vld [vmem:[#allocation5] sm:$0x3] }
  0x1a   :  { %v49_v2 = vunpack.c.l.s4 %v146_v1  ;;  %v36_v12 = vld [vmem:[#allocation2] sm:$0xf]  ;;  %s147_s0 = smov [#allocation7]  }
  0x1b   :  { %v40_v3 = vshrl.u32 %v39_v0, 7  ;;  %s64_s19 = sshll.u32 %s147_s0, 4  ;;  %s65_s19 = int_to_ptr.vmem [resolvable:$true] %s64_s19 }
  0x1c   :  { %v50_v6 = vunpack.c.0.s8 %v49_v2  ;;  %s118_s1 = scalar_lea.vmem %s65_s19, 64  ;;  %p123_p11 = scmp.lt.s32.totalorder %s65_s19, %s65_s19 }
  0x1d   :  { %v41_v4 = vsub.s32 0, %v40_v3  ;;  %v45_v5 = vsub.s32 1, %v40_v3  ;;  %p119_p10 = scmp.ne.s32.totalorder %s65_s19, %s118_s1  ;;  %p124_p12 = scmp.lt.s32.totalorder %s118_s1, %s118_s1 }
  0x1e   :  { %v53_v10 = vsub.s32 %v50_v6, %v40_v3 }
  0x1f   :  { %v42_v8 = vrot.slane %v37_v7, %v41_v4  ;;  %v46_v9 = vrot.slane %v37_v7, %v45_v5  ;;  %p125_p13 = por %p124_p12, %p123_p11 }
  0x21   :  { %v47_v11 = vcombine.low %v42_v8, %v46_v9  ;;  %p126_p0 = pnand %p125_p13, %p119_p10 }
  0x23   :  { %v54_v13 = vrot.slane %v47_v11, %v53_v10 }
  0x25   :  { %v56_v14 = vadd.f32 %v54_v13, %v36_v12 }
  0x27   :  { %57 = vst [vmem:[#allocation7] sm:$0xf] %v56_v14 }
  0x28   :  { %129 = shalt.err (!%p126_p0)
}
  0x29   :  { %67 = dma.vmem_to_hbm [thread:$0]  %s65_s19, 64, %s174_s2, [#allocation4]  }
  0x2a   :  { %142 = dma.done.wait [#allocation4], 64  }
  0x2b   :  { %143 = vsyncadd [#allocation4], 4294967232 }
  0x2c   :  { %71 = vsyncpa [#allocation3], 1 }
  0x2d   :  { %72 = vsyncpa [#allocation6], 1 }
  0x2e   :  { %73 = vsyncpa [#allocation4], 1 }

</bundles_post_ra>
